<compile_context>
chip_gen: v7x
topology: tpu7x:2x2x1
jax: 0.10.0
libtpu: 0.0.40
codegen_flags: <defaults>
</compile_context>

<pallas_src>
import jax
import jax.numpy as jnp
from jax.experimental import pallas as pl
from jax.experimental.pallas import tpu as pltpu

LANE = 128   # lane width (last-dim alignment)
SUB = 8      # sublane width (second-to-last-dim alignment)


def _round_up(n, m):
    return ((n + m - 1) // m) * m


def _actor_kernel(x_ref, w1_ref, b1_ref, w2_ref, b2_ref, w3_ref, b3_ref, o_ref):
    # Layer 1: Linear + ReLU  (bf16 operands -> MXU, f32 accumulate / elementwise)
    h = jnp.dot(x_ref[...], w1_ref[...], preferred_element_type=jnp.float32)
    h = jnp.maximum(h + b1_ref[...], 0.0)
    # Layer 2: Linear + ReLU
    h = jnp.dot(h.astype(w2_ref.dtype), w2_ref[...],
                preferred_element_type=jnp.float32)
    h = jnp.maximum(h + b2_ref[...], 0.0)
    # Output layer: Linear + tanh (Actor head; tanh runs on the EUP)
    y = jnp.dot(h.astype(w3_ref.dtype), w3_ref[...],
                preferred_element_type=jnp.float32)
    y = jnp.tanh(y + b3_ref[...])
    o_ref[...] = y.astype(o_ref.dtype)


def init_params(key, input_shape, output_shape, hidden_layers_sizes):
    """PyTorch nn.Linear default init: U(-1/sqrt(fan_in), 1/sqrt(fan_in)).
    Weights stored as (in, out) == PyTorch weight.T; biases as (1, out)."""
    sizes = [input_shape] + list(hidden_layers_sizes) + [output_shape]
    params = []
    for i in range(len(sizes) - 1):
        fan_in, fan_out = sizes[i], sizes[i + 1]
        key, kw, kb = jax.random.split(key, 3)
        bound = 1.0 / jnp.sqrt(jnp.float32(fan_in))
        w = jax.random.uniform(kw, (fan_in, fan_out), jnp.float32, -bound, bound)
        b = jax.random.uniform(kb, (1, fan_out), jnp.float32, -bound, bound)
        params.extend([w, b])
    return tuple(params)


def pad_params(params):
    """Zero-pad all feature dims to multiples of 128 (lane-dense) and cast the
    matmul operands (weights) to bf16.  Biases stay f32.  Done once, offline."""
    w1, b1, w2, b2, w3, b3 = params

    def pad_w(w):
        fi, fo = w.shape
        return jnp.pad(w.astype(jnp.bfloat16),
                       ((0, _round_up(fi, LANE) - fi),
                        (0, _round_up(fo, LANE) - fo)))

    def pad_b(b):
        fo = b.shape[-1]
        return jnp.pad(b.astype(jnp.float32),
                       ((0, 0), (0, _round_up(fo, LANE) - fo)))

    return (pad_w(w1), pad_b(b1), pad_w(w2), pad_b(b2), pad_w(w3), pad_b(b3))


def actor_forward(x, padded_params, out_dim, *, block_b=256):
    """Fused Actor MLP forward.  x: (batch, in_dim) f32.  Returns (batch, out_dim) f32."""
    w1, b1, w2, b2, w3, b3 = padded_params
    batch, in_dim = x.shape
    in_pad = w1.shape[0]
    out_pad = w3.shape[1]

    # Batch tiling: tile_b is a multiple of 8 (sublane); batch padded up to a
    # tile multiple so every grid step stores a full, unmasked tile.
    tile_b = min(block_b, _round_up(batch, SUB))
    batch_pad = _round_up(batch, tile_b)

    # Pad + cast the input once (lane-dense, bf16 for the MXU).  Zero rows/cols
    # are semantically inert (see header comment).
    x_pad = jnp.pad(x.astype(jnp.bfloat16),
                    ((0, batch_pad - batch), (0, in_pad - in_dim)))

    grid = (batch_pad // tile_b,)

    out_padded = pl.pallas_call(
        _actor_kernel,
        out_shape=jax.ShapeDtypeStruct((batch_pad, out_pad), jnp.float32),
        grid=grid,
        in_specs=[
            # x tiled along batch; weights/biases resident (same block every step)
            pl.BlockSpec((tile_b, in_pad), lambda i: (i, 0)),
            pl.BlockSpec(w1.shape, lambda i: (0, 0)),
            pl.BlockSpec(b1.shape, lambda i: (0, 0)),
            pl.BlockSpec(w2.shape, lambda i: (0, 0)),
            pl.BlockSpec(b2.shape, lambda i: (0, 0)),
            pl.BlockSpec(w3.shape, lambda i: (0, 0)),
            pl.BlockSpec(b3.shape, lambda i: (0, 0)),
        ],
        out_specs=pl.BlockSpec((tile_b, out_pad), lambda i: (i, 0)),
        compiler_params=pltpu.CompilerParams(
            dimension_semantics=("parallel",)),  # v7x: split batch tiles across 2 TCs
    )(x_pad, w1, b1, w2, b2, w3, b3)

    return out_padded[:batch, :out_dim]


def reference_forward_bf16(x, params):
    """Pure-JAX reference with the same bf16-operand / f32-accumulate recipe."""
    w1, b1, w2, b2, w3, b3 = params
    f = lambda a: a.astype(jnp.bfloat16)
    h = jnp.maximum(jnp.dot(f(x), f(w1), preferred_element_type=jnp.float32) + b1, 0.0)
    h = jnp.maximum(jnp.dot(f(h), f(w2), preferred_element_type=jnp.float32) + b2, 0.0)
    y = jnp.dot(f(h), f(w3), preferred_element_type=jnp.float32) + b3
    return jnp.tanh(y)


def reference_forward_f32(x, params):
    """Full-precision reference (loose-tolerance sanity check)."""
    w1, b1, w2, b2, w3, b3 = params
    h = jnp.maximum(x @ w1 + b1, 0.0)
    h = jnp.maximum(h @ w2 + b2, 0.0)
    return jnp.tanh(h @ w3 + b3)


# TODO(synk): the Adam optimizer / MSELoss training step of GenericDNNArch has
# no Pallas equivalent here; only the forward pass is implemented.

if __name__ == "__main__":
    # Actor(input_shape=16, output_shape=4, hidden_layers_sizes=[16, 16])
    input_shape = 16
    output_shape = 4
    hidden_layers_sizes = [16, 16]
    batch = 200  # non-multiple of the tile -> exercises batch padding + grid

    key = jax.random.PRNGKey(0)
    key, kx = jax.random.split(key)
    x = jax.random.normal(kx, (batch, input_shape), jnp.float32)

    params = init_params(key, input_shape, output_shape, hidden_layers_sizes)
    padded = pad_params(params)

    out = actor_forward(x, padded, output_shape, block_b=64)  # grid of 4 batch tiles
    out = jax.block_until_ready(out)
    assert out.shape == (batch, output_shape)

    ref_bf16 = reference_forward_bf16(x, params)
    ref_f32 = reference_forward_f32(x, params)
    assert jnp.allclose(out, ref_bf16, atol=1e-3, rtol=1e-3), "mismatch vs bf16 reference"
    assert jnp.allclose(out, ref_f32, atol=3e-2, rtol=3e-2), "mismatch vs f32 reference"

    print("KERNEL_OK")
</pallas_src>

<mosaic_0001>
module attributes {stable_mosaic.version = 11 : i64} {
  func.func @_actor_kernel(%arg0: i32, %arg1: memref<64x128xbf16, #tpu.memory_space<vmem>>, %arg2: memref<128x128xbf16, #tpu.memory_space<vmem>>, %arg3: memref<1x128xf32, #tpu.memory_space<vmem>>, %arg4: memref<128x128xbf16, #tpu.memory_space<vmem>>, %arg5: memref<1x128xf32, #tpu.memory_space<vmem>>, %arg6: memref<128x128xbf16, #tpu.memory_space<vmem>>, %arg7: memref<1x128xf32, #tpu.memory_space<vmem>>, %arg8: memref<64x128xf32, #tpu.memory_space<vmem>>) attributes {dimension_semantics = [#tpu.dimension_semantics<parallel>], iteration_bounds = array<i64: 4>, scalar_prefetch = 0 : i64, scratch_operands = 0 : i64, tpu.core_type = #tpu.core_type<tc>, window_params = [{transform_indices = @transform_0, window_bounds = array<i64: 64, 128>}, {pipeline_mode = #tpu.pipeline_mode<synchronous>, transform_indices = @transform_1, window_bounds = array<i64: 128, 128>}, {pipeline_mode = #tpu.pipeline_mode<synchronous>, transform_indices = @transform_2, window_bounds = array<i64: 1, 128>}, {pipeline_mode = #tpu.pipeline_mode<synchronous>, transform_indices = @transform_3, window_bounds = array<i64: 128, 128>}, {pipeline_mode = #tpu.pipeline_mode<synchronous>, transform_indices = @transform_4, window_bounds = array<i64: 1, 128>}, {pipeline_mode = #tpu.pipeline_mode<synchronous>, transform_indices = @transform_5, window_bounds = array<i64: 128, 128>}, {pipeline_mode = #tpu.pipeline_mode<synchronous>, transform_indices = @transform_6, window_bounds = array<i64: 1, 128>}, {transform_indices = @transform_7, window_bounds = array<i64: 64, 128>}]} {
    %c0 = arith.constant 0 : index
    %c0_0 = arith.constant 0 : index
    %0 = vector.load %arg1[%c0, %c0_0] : memref<64x128xbf16, #tpu.memory_space<vmem>>, vector<64x128xbf16>
    %c0_1 = arith.constant 0 : index
    %c0_2 = arith.constant 0 : index
    %1 = vector.load %arg2[%c0_1, %c0_2] : memref<128x128xbf16, #tpu.memory_space<vmem>>, vector<128x128xbf16>
    %cst = arith.constant dense<0.000000e+00> : vector<64x128xf32>
    %2 = tpu.matmul %0, %1, %cst {dimension_numbers = #tpu.dot_dimension_numbers<[1], [0], [0], [1], [0, 0, 1, 1], [], []>} : vector<64x128xbf16>, vector<128x128xbf16>, vector<64x128xf32> -> vector<64x128xf32>
    %c0_3 = arith.constant 0 : index
    %c0_4 = arith.constant 0 : index
    %3 = vector.load %arg3[%c0_3, %c0_4] : memref<1x128xf32, #tpu.memory_space<vmem>>, vector<1x128xf32>
    %4 = vector.broadcast %3 : vector<1x128xf32> to vector<64x128xf32>
    %5 = arith.addf %2, %4 : vector<64x128xf32>
    %cst_5 = arith.constant 0.000000e+00 : f32
    %6 = vector.broadcast %cst_5 : f32 to vector<64x128xf32>
    %7 = arith.maximumf %5, %6 : vector<64x128xf32>
    %8 = arith.truncf %7 : vector<64x128xf32> to vector<64x128xbf16>
    %c0_6 = arith.constant 0 : index
    %c0_7 = arith.constant 0 : index
    %9 = vector.load %arg4[%c0_6, %c0_7] : memref<128x128xbf16, #tpu.memory_space<vmem>>, vector<128x128xbf16>
    %cst_8 = arith.constant dense<0.000000e+00> : vector<64x128xf32>
    %10 = tpu.matmul %8, %9, %cst_8 {dimension_numbers = #tpu.dot_dimension_numbers<[1], [0], [0], [1], [0, 0, 1, 1], [], []>} : vector<64x128xbf16>, vector<128x128xbf16>, vector<64x128xf32> -> vector<64x128xf32>
    %c0_9 = arith.constant 0 : index
    %c0_10 = arith.constant 0 : index
    %11 = vector.load %arg5[%c0_9, %c0_10] : memref<1x128xf32, #tpu.memory_space<vmem>>, vector<1x128xf32>
    %12 = vector.broadcast %11 : vector<1x128xf32> to vector<64x128xf32>
    %13 = arith.addf %10, %12 : vector<64x128xf32>
    %cst_11 = arith.constant 0.000000e+00 : f32
    %14 = vector.broadcast %cst_11 : f32 to vector<64x128xf32>
    %15 = arith.maximumf %13, %14 : vector<64x128xf32>
    %16 = arith.truncf %15 : vector<64x128xf32> to vector<64x128xbf16>
    %c0_12 = arith.constant 0 : index
    %c0_13 = arith.constant 0 : index
    %17 = vector.load %arg6[%c0_12, %c0_13] : memref<128x128xbf16, #tpu.memory_space<vmem>>, vector<128x128xbf16>
    %cst_14 = arith.constant dense<0.000000e+00> : vector<64x128xf32>
    %18 = tpu.matmul %16, %17, %cst_14 {dimension_numbers = #tpu.dot_dimension_numbers<[1], [0], [0], [1], [0, 0, 1, 1], [], []>} : vector<64x128xbf16>, vector<128x128xbf16>, vector<64x128xf32> -> vector<64x128xf32>
    %c0_15 = arith.constant 0 : index
    %c0_16 = arith.constant 0 : index
    %19 = vector.load %arg7[%c0_15, %c0_16] : memref<1x128xf32, #tpu.memory_space<vmem>>, vector<1x128xf32>
    %20 = vector.broadcast %19 : vector<1x128xf32> to vector<64x128xf32>
    %21 = arith.addf %18, %20 : vector<64x128xf32>
    %22 = math.tanh %21 : vector<64x128xf32>
    %c0_17 = arith.constant 0 : index
    %c0_18 = arith.constant 0 : index
    %23 = vector.load %arg8[%c0_17, %c0_18] : memref<64x128xf32, #tpu.memory_space<vmem>>, vector<64x128xf32>
    tpu.vector_store %arg8[%c0_17, %c0_18], %22 {strides = array<i32>} : memref<64x128xf32, #tpu.memory_space<vmem>>, vector<64x128xf32>,
    return
  }
  func.func @transform_0(%arg0: i32) -> (i32, i32) {
    %c0_i32 = arith.constant 0 : i32
    %c0_i32_0 = arith.constant 0 : i32
    return %arg0, %c0_i32 : i32, i32
  }
  func.func @transform_1(%arg0: i32) -> (i32, i32) {
    %c0_i32 = arith.constant 0 : i32
    %c0_i32_0 = arith.constant 0 : i32
    %c0_i32_1 = arith.constant 0 : i32
    return %c0_i32, %c0_i32_0 : i32, i32
  }
  func.func @transform_2(%arg0: i32) -> (i32, i32) {
    %c0_i32 = arith.constant 0 : i32
    %c0_i32_0 = arith.constant 0 : i32
    %c0_i32_1 = arith.constant 0 : i32
    return %c0_i32, %c0_i32_0 : i32, i32
  }
  func.func @transform_3(%arg0: i32) -> (i32, i32) {
    %c0_i32 = arith.constant 0 : i32
    %c0_i32_0 = arith.constant 0 : i32
    %c0_i32_1 = arith.constant 0 : i32
    return %c0_i32, %c0_i32_0 : i32, i32
  }
  func.func @transform_4(%arg0: i32) -> (i32, i32) {
    %c0_i32 = arith.constant 0 : i32
    %c0_i32_0 = arith.constant 0 : i32
    %c0_i32_1 = arith.constant 0 : i32
    return %c0_i32, %c0_i32_0 : i32, i32
  }
  func.func @transform_5(%arg0: i32) -> (i32, i32) {
    %c0_i32 = arith.constant 0 : i32
    %c0_i32_0 = arith.constant 0 : i32
    %c0_i32_1 = arith.constant 0 : i32
    return %c0_i32, %c0_i32_0 : i32, i32
  }
  func.func @transform_6(%arg0: i32) -> (i32, i32) {
    %c0_i32 = arith.constant 0 : i32
    %c0_i32_0 = arith.constant 0 : i32
    %c0_i32_1 = arith.constant 0 : i32
    return %c0_i32, %c0_i32_0 : i32, i32
  }
  func.func @transform_7(%arg0: i32) -> (i32, i32) {
    %c0_i32 = arith.constant 0 : i32
    %c0_i32_0 = arith.constant 0 : i32
    return %arg0, %c0_i32 : i32, i32
  }
}

</mosaic_0001>

<bundles_post_ra>
// kernel: tpu_custom_call.1
= control target key start
LH: loop header
LB: loop body
LE: loop exit
PB: predicated region body
PF: predicated region fallthrough
CT: control target
= control target key end

     0   :  { %12 = vsyncpa [#allocation3], 0  ;;  %s1766_s0 = inlined_call_operand.hbm [shape: bf16[256,128], index: 0, kind: input, shape index: {}]   ;;  %s1767_s1 = inlined_call_operand.hbm [shape: bf16[128,128], index: 1, kind: input, shape index: {}]   ;;  %s1768_s2 = inlined_call_operand.vmem [shape: f32[1,128], index: 2, kind: input, shape index: {}]   ;;  %s1769_s3 = inlined_call_operand.hbm [shape: bf16[128,128], index: 3, kind: input, shape index: {}]   ;;  %s1770_s4 = inlined_call_operand.vmem [shape: f32[1,128], index: 4, kind: input, shape index: {}]   ;;  %s1771_s5 = inlined_call_operand.hbm [shape: bf16[128,128], index: 5, kind: input, shape index: {}]   ;;  %s1772_s6 = inlined_call_operand.vmem [shape: f32[1,128], index: 6, kind: input, shape index: {}]   ;;  %s1773_s7 = inlined_call_operand.hbm [shape: f32[256,128], index: 7, kind: output, shape index: {}]  }
   0x1   :  { %14 = vsyncpa [#allocation3 + $0x1], 0 }
   0x2   :  { %15 = vsyncpa [#allocation6], 0 }
   0x3   :  { %16 = vsyncpa [#allocation9], 0 }
   0x4   :  { %17 = vsyncpa [#allocation4], 0 }
   0x5   :  { %19 = vsyncpa [#allocation4 + $0x1], 0  ;;  %s1481_s24 = smov 0   ;;  %s1483_s25 = smov 0  }
   0x6   :  { %s1485_s26 = smov 0   ;;  %s1487_s27 = smov 0  }
   0x7 LB: > { %s1502_s28 = sadd.s32 4294967295, %s1430_s27   ;;  %s940_s29 = sadd.s32 4294967294, %s1430_s27   ;;  %s1430_s27 = sphi %s1487_s27, %s1798_s27   ;;  %s1426_s26 = sphi %s1485_s26, %s1797_s26   ;;  %s1422_s25 = sphi %s1483_s25, %s1796_s25   ;;  %s1418_s24 = sphi %s1481_s24, %s1795_s24  }
   0x8   : > { %p45_p0 = scmp.ne.s32.totalorder %s1422_s25, %s1418_s24  ;;  %p1774_p1 = scmp.eq.s32.totalorder %s1502_s28, 0 }
   0x9   : > { %p201_p3 = scmp.eq.s32.totalorder %s940_s29, 3  ;;  %p941_p5 = scmp.ge.s32.totalorder %s1430_s27, 1 }
   0xa   : > { %p1511_p4 = por %p1774_p1, %p45_p0  ;;  %p208_p7 = scmp.lt.s32.totalorder %s1430_s27, 5 }
   0xb   : > { %p1516_p6 = por %p201_p3, %p45_p0  ;;  %s1432_s10 = smov [#allocation5]  }
   0xc   : > { %s1778_s30 = scalar_select %p1511_p4, 1, 0 }
   0xd   : > { %s1779_s8 = scalar_select %p1516_p6, 1, 0 }
   0xe   : > { %p1521_p8 = pnand %p941_p5, %p208_p7  ;;  %s220_s11 = sshll.u32 %s1432_s10, 4  ;;  %s1525_s11 = int_to_ptr.vmem [resolvable:$true] %s220_s11 }
   0xf   : > { %1780 = sst [smem:[#allocation15_spill]] %s1779_s8  ;;  %s1433_s13 = smov [#allocation7]  }
  0x10   : > { %s1781_s9 = scalar_select %p1521_p8, 1, 0 }
  0x11   : > { %p1133_p9 = pneg %p1521_p8  ;;  %s236_s14 = sshll.u32 %s1433_s13, 4  ;;  %s1535_s14 = int_to_ptr.vmem [resolvable:$true] %s236_s14 }
  0x12   : > { %s1434_s15 = smov [#allocation8]   ;;  %s1242_s19 = scalar_lea.hbm %s1767_s1, 1024 }
  0x13   : > { %p1531_p10 = pnand %p1133_p9, %p1774_p1  ;;  %s1537_s16 = sshll.u32 %s1434_s15, 4  ;;  %s253_s16 = int_to_ptr.vmem [resolvable:$true] %s1537_s16 }
  0x14   : > { %p1243_p11 = scmp.ne.s32.totalorder %s1767_s1, %s1242_s19  ;;  %p1249_p3 = scmp.lt.u32.totalorder %s1242_s19, %s1767_s1 }
  0x15   : > { %p1547_p12 = pneg %p1531_p10 }
  0x17   : > { %p1245_p13 = pnand %p1547_p12, %p1243_p11 }
  0x19   : > { %p1246_p0 = pneg %p1245_p13 }
  0x1b   : > { %p1251_p5 = pnand %p1249_p3, %p1246_p0 }
  0x1d   : > { %1254 = shalt.err (!%p1251_p5)
}
  0x1e   : > { %s1255_s10 = scalar_lea.vmem %s1525_s11, 1024  ;;  %p1263_p2 = scmp.lt.s32.totalorder %s1525_s11, %s1525_s11 }
  0x1f   : > { %p1256_p7 = scmp.ne.s32.totalorder %s1525_s11, %s1255_s10  ;;  %p1264_p6 = scmp.lt.s32.totalorder %s1255_s10, %s1255_s10 }
  0x21   : > { %p1258_p9 = pnand %p1256_p7, %p1547_p12  ;;  %p1265_p11 = por %p1264_p6, %p1263_p2 }
  0x23   : > { %p1259_p1 = pneg %p1258_p9 }
  0x25   : > { %p1266_p13 = pnand %p1265_p11, %p1259_p1 }
  0x27   : > { %1269 = shalt.err (!%p1266_p13)
}
  0x28   : > { %s1435_s13 = smov 64   ;;  %s1436_s15 = smov 4  }
  0x29   : > { %1136 = dma.hbm_to_vmem [thread:$0]  (!%p1531_p10), %s1767_s1, 1024, %s1525_s11, [#allocation6], %s1435_s13, %s1435_s13, %s1436_s15  }
  0x2a   : > { %s1270_s21 = scalar_lea.hbm %s1769_s3, 1024 }
  0x2b   : > { %p1271_p1 = scmp.ne.s32.totalorder %s1769_s3, %s1270_s21  ;;  %p1277_p0 = scmp.lt.u32.totalorder %s1270_s21, %s1769_s3 }
  0x2d   : > { %p1273_p2 = pnand %p1271_p1, %p1547_p12 }
  0x2f   : > { %p1274_p6 = pneg %p1273_p2 }
  0x31   : > { %p1279_p3 = pnand %p1277_p0, %p1274_p6 }
  0x33   : > { %1282 = shalt.err (!%p1279_p3)
}
  0x34   : > { %s1283_s11 = scalar_lea.vmem %s1535_s14, 1024  ;;  %p1291_p11 = scmp.lt.s32.totalorder %s1535_s14, %s1535_s14 }
  0x35   : > { %p1284_p5 = scmp.ne.s32.totalorder %s1535_s14, %s1283_s11  ;;  %p1292_p13 = scmp.lt.s32.totalorder %s1283_s11, %s1283_s11 }
  0x37   : > { %p1286_p7 = pnand %p1284_p5, %p1547_p12  ;;  %p1293_p1 = por %p1292_p13, %p1291_p11 }
  0x39   : > { %p1287_p9 = pneg %p1286_p7 }
  0x3b   : > { %p1294_p2 = pnand %p1293_p1, %p1287_p9 }
  0x3d   : > { %1297 = shalt.err (!%p1294_p2)
}
  0x3e   : > { %1139 = dma.hbm_to_vmem [thread:$0]  (!%p1531_p10), %s1769_s3, 1024, %s1535_s14, [#allocation6], %s1435_s13, %s1435_s13, %s1436_s15  }
  0x3f   : > { %s1298_s20 = scalar_lea.hbm %s1771_s5, 1024 }
  0x40   : > { %p1299_p6 = scmp.ne.s32.totalorder %s1771_s5, %s1298_s20  ;;  %p1305_p5 = scmp.lt.u32.totalorder %s1298_s20, %s1771_s5 }
  0x42   : > { %p1301_p0 = pnand %p1299_p6, %p1547_p12 }
  0x44   : > { %p1302_p3 = pneg %p1301_p0 }
  0x46   : > { %p1307_p7 = pnand %p1305_p5, %p1302_p3 }
  0x48   : > { %1310 = shalt.err (!%p1307_p7)
}
  0x49   : > { %s1311_s11 = scalar_lea.vmem %s253_s16, 1024  ;;  %p1319_p1 = scmp.lt.s32.totalorder %s253_s16, %s253_s16 }
  0x4a   : > { %p1312_p9 = scmp.ne.s32.totalorder %s253_s16, %s1311_s11  ;;  %p1320_p2 = scmp.lt.s32.totalorder %s1311_s11, %s1311_s11 }
  0x4c   : > { %p1314_p11 = pnand %p1312_p9, %p1547_p12  ;;  %p1321_p4 = por %p1320_p2, %p1319_p1 }
  0x4e   : > { %p1315_p13 = pneg %p1314_p11 }
  0x50   : > { %p1322_p8 = pnand %p1321_p4, %p1315_p13 }
  0x52   : > { %1325 = shalt.err (!%p1322_p8)
}
  0x53   : > { %1142 = dma.hbm_to_vmem [thread:$0]  (!%p1531_p10), %s1771_s5, 1024, %s253_s16, [#allocation9], %s1435_s13, %s1435_s13, %s1436_s15  }
  0x54   : > { %s1620_s22 = sadd.s32 1, %s1430_s27   ;;  %s32_s17 = sadd.s32 1, %s1426_s26 }
  0x55   : > { %s29_s12 = ssub.s32 %s1430_s27, %s1620_s22  ;;  %p39_p8 = scmp.ne.s32.totalorder %s1426_s26, %s1422_s25 }
  0x56   : > { %p30_p4 = scmp.eq.s32.totalorder %s29_s12, 0  ;;  %p40_p12 = scmp.eq.s32.totalorder %s1430_s27, 0 }
  0x57   : > { %p1154_p6 = scmp.lt.s32.totalorder %s1430_s27, 4  ;;  %p1784_p3 = scmp.eq.s32.totalorder %s1502_s28, 3 }
  0x58   : > { %s1630_s18 = scalar_select %p30_p4, %s1426_s26, %s32_s17  }
  0x59   : > { %p41_p0 = por %p40_p12, %p39_p8  ;;  %p1634_p5 = por %p1784_p3, %p39_p8 }
  0x5a   : > { %s269_s20 = sand.u32 1, %s1426_s26   ;;  %s991_s21 = sshll.u32 %s1430_s27, 9 }
  0x5b   : > { %s946_s16 = sshll.u32 %s269_s20, 5  ;;  %s1643_s10 = scalar_lea.hbm %s1766_s0, %s991_s21 }
  0x5c   : > { %s273_s11 = scalar_lea.vmem [#allocation2], %s946_s16  ;;  %p1645_p10 = pnand %p1154_p6, %p41_p0 }
  0x5d   : > { %s280_s14 = sshll.u32 %s273_s11, 4  ;;  %s1651_s12 = scalar_lea.sflag [#allocation3], %s269_s20  ;;  %s1649_s14 = int_to_ptr.vmem [resolvable:$true] %s280_s14 }
  0x5e   : > { %s1326_s17 = scalar_lea.hbm %s1643_s10, 512  ;;  %p1328_p9 = pneg %p1645_p10 }
  0x5f   : > { %p1327_p7 = scmp.ne.s32.totalorder %s1643_s10, %s1326_s17  ;;  %s1331_s23 = scalar_lea.hbm %s1766_s0, 2048 }
  0x60   : > { %p1332_p1 = scmp.lt.u32.totalorder %s1643_s10, %s1766_s0  ;;  %p1333_p2 = scmp.lt.u32.totalorder %s1331_s23, %s1326_s17 }
  0x61   : > { %p1329_p11 = pnand %p1328_p9, %p1327_p7  ;;  %p1335_p8 = scmp.lt.u32.totalorder %s1326_s17, %s1643_s10 }
  0x62   : > { %p1334_p4 = por %p1333_p2, %p1332_p1 }
  0x63   : > { %p1330_p13 = pneg %p1329_p11 }
  0x64   : > { %p1336_p12 = por %p1335_p8, %p1334_p4 }
  0x66   : > { %p1337_p6 = pnand %p1336_p12, %p1330_p13 }
  0x68   : > { %1340 = shalt.err (!%p1337_p6)
}
  0x69   : > { %s1341_s20 = scalar_lea.vmem %s1649_s14, 512  ;;  %s1437_s21 = smov [#allocation2]  }
  0x6a   : > { %p1342_p0 = scmp.ne.s32.totalorder %s1649_s14, %s1341_s20  ;;  %s1346_s16 = sshll.u32 %s1437_s21, 4  ;;  %s1347_s16 = int_to_ptr.vmem [resolvable:$false] %s1346_s16 }
  0x6b   : > { %s1348_s29 = scalar_lea.vmem %s1347_s16, 1024  ;;  %p1349_p11 = scmp.lt.s32.totalorder %s1649_s14, %s1347_s16 }
  0x6c   : > { %p1344_p3 = pnand %p1342_p0, %p1328_p9  ;;  %p1350_p1 = scmp.lt.s32.totalorder %s1348_s29, %s1341_s20 }
  0x6e   : > { %p1345_p7 = pneg %p1344_p3  ;;  %p1351_p2 = por %p1350_p1, %p1349_p11 }
  0x70   : > { %p1352_p4 = pnand %p1351_p2, %p1345_p7 }
  0x72   : > { %1355 = shalt.err (!%p1352_p4)
}
  0x73   : > { %1146 = dma.hbm_to_vmem [thread:$0]  (!%p1645_p10), %s1643_s10, 512, %s1649_s14, %s1651_s12, %s1435_s13, %s1435_s13, %s1436_s15  }
  0x74   : > { %p1787_p9 = scmp.ne.s32.totalorder %s1781_s9, 0 }
  0x75   : > { %s1685_s17 = sand.u32 (!%p1787_p9), 1, %s1422_s25   ;;  %p1788_p13 = scmp.ne.s32.totalorder (!%p1787_p9), %s1778_s30, 0 }
  0x76   : > { %292 = sbr.rel (%p1787_p9) target bundleno = 861 (0x35d), region = 48  ;;  %s950_s23 = sshll.u32 (!%p1787_p9), %s1685_s17, 5 }
  0x77   : > { %s295_s11 = scalar_lea.sflag (!%p1787_p9), [#allocation3], %s1685_s17  ;;  %s1689_s20 = scalar_lea.vmem (!%p1787_p9), [#allocation2], %s950_s23 }
  0x7d   : > { %1401 = dma.done.wait (%p1788_p13), %s295_s11, 512  }
  0x7e   : > { %1403 = vsyncadd (%p1788_p13), %s295_s11, 4294966784  ;;  %p1789_p10 = scmp.eq.s32.totalorder %s1502_s28, 0 }
  0x80   : > { %1405 = dma.done.wait (%p1789_p10), [#allocation6], 2048   ;;  %p1790_p8 = pmov %p1789_p10 }
  0x82   : > { %1407 = vsyncadd (%p1790_p8), [#allocation6], 4294965248  ;;  %p1791_p12 = pmov %p1790_p8 }
  0x83   : > { %p1792_p6 = pmov %p1790_p8 }
  0x84   : > { %1409 = dma.done.wait (%p1791_p12), [#allocation9], 1024  }
  0x85   : > { %1411 = vsyncadd (%p1792_p6), [#allocation9], 4294966272  ;;  %v1198_v0 = vld [vmem:[#allocation5] sm:$0xff]   ;;  %v1199_v1 = vld [vmem:[#allocation5 + $0x8] sm:$0xff]   ;;  %s954_s8 = sshll.u32 %s1685_s17, 6  ;;  %s992_s21 = sshll.u32 %s1502_s28, 10 }
  0x86   : > { %1029 = vmatprep.subr.bf16.mxu0 %v1198_v0  ;;  %v1200_v2 = vld [vmem:[#allocation5 + $0x10] sm:$0xff]   ;;  %v1201_v3 = vld [vmem:[#allocation5 + $0x18] sm:$0xff]   ;;  %v1206_v4 = vld [vmem:[%s1689_s20] sm:$0xff]   ;;  %s340_s12 = scalar_lea.vmem [#allocation10], %s954_s8  ;;  %s1721_s11 = scalar_lea.hbm %s1773_s7, %s992_s21 }
  0x87   : > { %1030 = vmatpush3.bf16.msra.mxu0 %v1198_v0  ;;  %1045 = vmatprep.mubr.bf16.mxu0 %v1206_v4  ;;  %v1202_v5 = vld [vmem:[#allocation5 + $0x20] sm:$0xff]   ;;  %v1211_v7 = vld [vmem:[#allocation7 + $0x8] sm:$0xff]   ;;  %v1212_v9 = vld [vmem:[#allocation7 + $0x10] sm:$0xff]   ;;  %s838_s16 = sshll.u32 %s340_s12, 4  ;;  %s825_s28 = scalar_lea.sflag [#allocation4], %s1685_s17  ;;  %s1723_s16 = int_to_ptr.vmem [resolvable:$true] %s838_s16 }
  0x88   : > { %1031 = vmatprep.subr.bf16.mxu0 %v1199_v1  ;;  %v1210_v6 = vld [vmem:[#allocation7] sm:$0xff]   ;;  %v1203_v8 = vld [vmem:[#allocation5 + $0x28] sm:$0xff]   ;;  %v1204_v10 = vld [vmem:[#allocation5 + $0x30] sm:$0xff]   ;;  %s1438_s30 = smov [#allocation10]  }
  0x89   : > { %1053 = vmatprep.subr.bf16.mxu1 %v1210_v6  ;;  %v1213_v11 = vld [vmem:[#allocation7 + $0x18] sm:$0xff]   ;;  %v1214_v13 = vld [vmem:[#allocation7 + $0x20] sm:$0xff]   ;;  %v1215_v14 = vld [vmem:[#allocation7 + $0x28] sm:$0xff]   ;;  %s1360_s9 = sshll.u32 %s1438_s30, 4  ;;  %s1361_s9 = int_to_ptr.vmem [resolvable:$false] %s1360_s9 }
  0x8a   : > { %1054 = vmatpush3.bf16.msra.mxu1 %v1210_v6  ;;  %v1205_v12 = vld [vmem:[#allocation5 + $0x38] sm:$0xff]   ;;  %v1207_v15 = vld [vmem:[%s1689_s20 + $0x8] sm:$0xff]   ;;  %v1208_v16 = vld [vmem:[%s1689_s20 + $0x10] sm:$0xff]   ;;  %s1362_s13 = scalar_lea.vmem %s1361_s9, 2048  ;;  %p1363_p11 = scmp.lt.s32.totalorder %s1723_s16, %s1361_s9 }
  0x8b   : > { %1032 = vmatpush3.bf16.msra.mxu0 %v1199_v1  ;;  %1055 = vmatprep.subr.bf16.mxu1 %v1211_v7  ;;  %v1209_v17 = vld [vmem:[%s1689_s20 + $0x18] sm:$0xff]   ;;  %v1216_v18 = vld [vmem:[#allocation7 + $0x30] sm:$0xff]   ;;  %v1218_v20 = vld [vmem:[#allocation8] sm:$0xff]   ;;  %s1356_s20 = scalar_lea.vmem %s1723_s16, 1024 }
  0x8c   : > { %1033 = vmatprep.subr.bf16.mxu0 %v1200_v2  ;;  %v1217_v19 = vld [vmem:[#allocation7 + $0x38] sm:$0xff]   ;;  %v1219_v21 = vld [vmem:[#allocation8 + $0x8] sm:$0xff]   ;;  %v1220_v22 = vld [vmem:[#allocation8 + $0x10] sm:$0xff]   ;;  %p1357_p0 = scmp.ne.s32.totalorder %s1723_s16, %s1356_s20  ;;  %p1364_p1 = scmp.lt.s32.totalorder %s1362_s13, %s1356_s20 }
  0x8d   : > { %v1221_v23 = vld [vmem:[#allocation8 + $0x18] sm:$0xff]   ;;  %v1222_v24 = vld [vmem:[#allocation8 + $0x20] sm:$0xff]   ;;  %v1223_v25 = vld [vmem:[#allocation8 + $0x28] sm:$0xff]  }
  0x8e   : > { %1056 = vmatpush3.bf16.msra.mxu1 %v1211_v7  ;;  %v955_v26 = vld [vmem:[%s1768_s2] ss:$0 sm:$0xff]  ;;  %v1224_v55 = vld [vmem:[#allocation8 + $0x30] sm:$0xff]   ;;  %v1225_v56 = vld [vmem:[#allocation8 + $0x38] sm:$0xff]   ;;  %p1358_p3 = pnand %p1357_p0, %p1634_p5  ;;  %p1365_p2 = por %p1364_p1, %p1363_p11 }
  0x8f   : > { %1034 = vmatpush3.bf16.msra.mxu0 %v1200_v2  ;;  %1057 = vmatprep.subr.bf16.mxu1 %v1212_v9  ;;  %v968_v57 = vld [vmem:[%s1770_s4] ss:$0 sm:$0xff] }
  0x90   : > { %1035 = vmatprep.subr.bf16.mxu0 %v1201_v3  ;;  %p1359_p7 = pneg %p1358_p3 }
  0x92   : > { %1058 = vmatpush3.bf16.msra.mxu1 %v1212_v9  ;;  %p1366_p4 = pnand %p1365_p2, %p1359_p7 }
  0x93   : > { %1036 = vmatpush3.bf16.msra.mxu0 %v1201_v3  ;;  %1059 = vmatprep.subr.bf16.mxu1 %v1213_v11 }
  0x94   : > { %1037 = vmatprep.subr.bf16.mxu0 %v1202_v5 }
  0x96   : > { %1060 = vmatpush3.bf16.msra.mxu1 %v1213_v11 }
  0x97   : > { %1038 = vmatpush3.bf16.msra.mxu0 %v1202_v5  ;;  %1061 = vmatprep.subr.bf16.mxu1 %v1214_v13 }
  0x98   : > { %1039 = vmatprep.subr.bf16.mxu0 %v1203_v8 }
  0x9a   : > { %1062 = vmatpush3.bf16.msra.mxu1 %v1214_v13 }
  0x9b   : > { %1040 = vmatpush3.bf16.msra.mxu0 %v1203_v8  ;;  %1063 = vmatprep.subr.bf16.mxu1 %v1215_v14 }
  0x9c   : > { %1041 = vmatprep.subr.bf16.mxu0 %v1204_v10 }
  0x9e   : > { %1064 = vmatpush3.bf16.msra.mxu1 %v1215_v14 }
  0x9f   : > { %1042 = vmatpush3.bf16.msra.mxu0 %v1204_v10  ;;  %1065 = vmatprep.subr.bf16.mxu1 %v1216_v18 }
  0xa0   : > { %1043 = vmatprep.subr.bf16.mxu0 %v1205_v12 }
  0xa2   : > { %1066 = vmatpush3.bf16.msra.mxu1 %v1216_v18 }
  0xa3   : > { %1044 = vmatpush3.bf16.msra.mxu0 %v1205_v12  ;;  %1067 = vmatprep.subr.bf16.mxu1 %v1217_v19 }
  0xa4   : > { %1077 = vmatprep.subr.bf16.mxu0 %v1218_v20 }
  0xa6   : > { %1046 = vmatmul.mubr.bf16.vlgmr.msra.gmra.mrb[0].mxu0 %v1207_v15  ;;  %1068 = vmatpush3.bf16.msra.mxu1 %v1217_v19 }
  0xa7   : > { %1049 = vmatprep.mubr.bf16.mxu0 %v1208_v16  ;;  %1101 = vmatprep.subr.bf16.mxu1 %v1218_v20 }
  0xa8   : > { %1078 = vmatpush3.bf16.msra.mxu0 %v1218_v20 }
  0xa9   : > { %1079 = vmatprep.subr.bf16.mxu0 %v1219_v21 }
  0xac   : > { %1080 = vmatpush3.bf16.msra.mxu0 %v1219_v21 }
  0xad   : > { %1081 = vmatprep.subr.bf16.mxu0 %v1220_v22 }
  0xae   : > { %1050 = vmatmul.mubr.bf16.gmra.mrb[4].mxu0 %v1209_v17 }
  0xb0   : > { %1082 = vmatpush3.bf16.msra.mxu0 %v1220_v22 }
  0xb1   : > { %1083 = vmatprep.subr.bf16.mxu0 %v1221_v23 }
  0xb4   : > { %1084 = vmatpush3.bf16.msra.mxu0 %v1221_v23 }
  0xb5   : > { %1085 = vmatprep.subr.bf16.mxu0 %v1222_v24 }
  0xb8   : > { %1086 = vmatpush3.bf16.msra.mxu0 %v1222_v24 }
  0xb9   : > { %1087 = vmatprep.subr.bf16.mxu0 %v1223_v25 }
  0xbc   : > { %1088 = vmatpush3.bf16.msra.mxu0 %v1223_v25 }
  0xbd   : > { %1089 = vmatprep.subr.bf16.mxu0 %v1224_v55 }
  0xc0   : > { %1090 = vmatpush3.bf16.msra.mxu0 %v1224_v55 }
  0xc1   : > { %1091 = vmatprep.subr.bf16.mxu0 %v1225_v56 }
  0xc4   : > { %1092 = vmatpush3.bf16.msra.mxu0 %v1225_v56 }
 0x179   : > { %v1047_v27 = vpop.f32.mrb[0].mxu0 }
 0x17a   : > { %v490_v28 = vadd.f32 %v1047_v27, %v955_v26  ;;  %v481_v29 = vpop.f32.mrb[1].mxu0 }
 0x17b   : > { %v482_v30 = vadd.f32 %v955_v26, %v481_v29  ;;  %v1048_v31 = vpop.f32.mrb[2].mxu0 }
 0x17c   : > { %v493_v32 = vadd.f32 %v1048_v31, %v955_v26  ;;  %v484_v33 = vpop.f32.mrb[3].mxu0  ;;  %v514_v35 = vmax.f32 %v490_v28, 0.0 }
 0x17d   : > { %v485_v34 = vadd.f32 %v955_v26, %v484_v33  ;;  %v512_v37 = vmax.f32 %v482_v30, 0.0 }
 0x17e   : > { %v515_v36 = vmax.f32 %v493_v32, 0.0 }
 0x17f   : > { %v513_v38 = vmax.f32 %v485_v34, 0.0 }
 0x180   : > { %v521_v39 = vpack.c.bf16 %v515_v36, %v514_v35 }
 0x181   : > { %v1051_v40 = vpop.f32.mrb[4].mxu0  ;;  %v520_v41 = vpack.c.bf16 %v513_v38, %v512_v37 }
 0x182   : > { %v506_v42 = vadd.f32 %v1051_v40, %v955_v26  ;;  %v497_v43 = vpop.f32.mrb[5].mxu0 }
 0x183   : > { %v498_v44 = vadd.f32 %v955_v26, %v497_v43  ;;  %v1052_v45 = vpop.f32.mrb[6].mxu0  ;;  %1069 = vmatprep.mubr.bf16.mxu1 %v520_v41 }
 0x184   : > { %v509_v46 = vadd.f32 %v1052_v45, %v955_v26  ;;  %v500_v47 = vpop.f32.mrb[7].mxu0  ;;  %1070 = vmatmul.mubr.bf16.vlgmr.msra.gmra.mrb[0].mxu1 %v521_v39  ;;  %v518_v49 = vmax.f32 %v506_v42, 0.0 }
 0x185   : > { %v501_v48 = vadd.f32 %v955_v26, %v500_v47  ;;  %1109 = vmatpush3.bf16.msra.mxu1 %v1218_v20  ;;  %v516_v51 = vmax.f32 %v498_v44, 0.0 }
 0x186   : > { %v519_v50 = vmax.f32 %v509_v46, 0.0  ;;  %1102 = vmatprep.subr.bf16.mxu1 %v1219_v21 }
 0x187   : > { %v517_v52 = vmax.f32 %v501_v48, 0.0 }
 0x188   : > { %v523_v53 = vpack.c.bf16 %v519_v50, %v518_v49 }
 0x189   : > { %v522_v54 = vpack.c.bf16 %v517_v52, %v516_v51  ;;  %1110 = vmatpush3.bf16.msra.mxu1 %v1219_v21 }
 0x18a   : > { %1103 = vmatprep.subr.bf16.mxu1 %v1220_v22 }
 0x18b   : > { %1073 = vmatprep.mubr.bf16.mxu1 %v522_v54 }
 0x18c   : > { %1074 = vmatmul.mubr.bf16.gmra.mrb[4].mxu1 %v523_v53 }
 0x18d   : > { %1111 = vmatpush3.bf16.msra.mxu1 %v1220_v22  ;;  %v977_v22 = vld [vmem:[%s1772_s6] ss:$0 sm:$0xff] }
 0x18e   : > { %1104 = vmatprep.subr.bf16.mxu1 %v1221_v23 }
 0x191   : > { %1112 = vmatpush3.bf16.msra.mxu1 %v1221_v23 }
 0x192   : > { %1105 = vmatprep.subr.bf16.mxu1 %v1222_v24 }
 0x195   : > { %1113 = vmatpush3.bf16.msra.mxu1 %v1222_v24 }
 0x196   : > { %1106 = vmatprep.subr.bf16.mxu1 %v1223_v25 }
 0x199   : > { %1114 = vmatpush3.bf16.msra.mxu1 %v1223_v25 }
 0x19a   : > { %1107 = vmatprep.subr.bf16.mxu1 %v1224_v55 }
 0x19d   : > { %1115 = vmatpush3.bf16.msra.mxu1 %v1224_v55 }
 0x19e   : > { %1108 = vmatprep.subr.bf16.mxu1 %v1225_v56 }
 0x1a1   : > { %1116 = vmatpush3.bf16.msra.mxu1 %v1225_v56 }
 0x257   : > { %v1071_v58 = vpop.f32.mrb[0].mxu1 }
 0x258   : > { %v638_v59 = vadd.f32 %v1071_v58, %v968_v57  ;;  %v629_v60 = vpop.f32.mrb[1].mxu1 }
 0x259   : > { %v630_v61 = vadd.f32 %v968_v57, %v629_v60  ;;  %v1072_v62 = vpop.f32.mrb[2].mxu1 }
 0x25a   : > { %v641_v63 = vadd.f32 %v1072_v62, %v968_v57  ;;  %v632_v0 = vpop.f32.mrb[3].mxu1  ;;  %v662_v2 = vmax.f32 %v638_v59, 0.0 }
 0x25b   : > { %v633_v1 = vadd.f32 %v968_v57, %v632_v0  ;;  %v660_v4 = vmax.f32 %v630_v61, 0.0 }
 0x25c   : > { %v663_v3 = vmax.f32 %v641_v63, 0.0 }
 0x25d   : > { %v661_v5 = vmax.f32 %v633_v1, 0.0 }
 0x25e   : > { %v669_v6 = vpack.c.bf16 %v663_v3, %v662_v2 }
 0x25f   : > { %v668_v7 = vpack.c.bf16 %v661_v5, %v660_v4  ;;  %v1075_v8 = vpop.f32.mrb[4].mxu1 }
 0x260   : > { %v654_v9 = vadd.f32 %v1075_v8, %v968_v57  ;;  %v645_v10 = vpop.f32.mrb[5].mxu1 }
 0x261   : > { %v646_v11 = vadd.f32 %v968_v57, %v645_v10  ;;  %v1076_v12 = vpop.f32.mrb[6].mxu1  ;;  %1093 = vmatprep.mubr.bf16.mxu0 %v668_v7 }
 0x262   : > { %v657_v13 = vadd.f32 %v1076_v12, %v968_v57  ;;  %v648_v14 = vpop.f32.mrb[7].mxu1  ;;  %1094 = vmatmul.mubr.bf16.vlgmr.msra.gmra.mrb[8].mxu0 %v669_v6  ;;  %v666_v16 = vmax.f32 %v654_v9, 0.0 }
 0x263   : > { %v649_v15 = vadd.f32 %v968_v57, %v648_v14  ;;  %v664_v18 = vmax.f32 %v646_v11, 0.0 }
 0x264   : > { %v667_v17 = vmax.f32 %v657_v13, 0.0 }
 0x265   : > { %v665_v19 = vmax.f32 %v649_v15, 0.0 }
 0x266   : > { %v671_v20 = vpack.c.bf16 %v667_v17, %v666_v16 }
 0x267   : > { %v670_v21 = vpack.c.bf16 %v665_v19, %v664_v18 }
 0x269   : > { %1097 = vmatprep.mubr.bf16.mxu1 %v670_v21 }
 0x26a   : > { %1098 = vmatmul.mubr.bf16.vlgmr.msra.gmra.mrb[8].mxu1 %v671_v20 }
 0x335   : > { %v1095_v23 = vpop.f32.mrb[8].mxu0 }
 0x336   : > { %v786_v24 = vadd.f32 %v1095_v23, %v977_v22  ;;  %v777_v25 = vpop.f32.mrb[9].mxu0 }
 0x337   : > { %v778_v26 = vadd.f32 %v977_v22, %v777_v25  ;;  %v1096_v27 = vpop.f32.mrb[10].mxu0 }
 0x338   : > { %1226 = vtanh.f32 %v786_v24  ;;  %v789_v28 = vadd.f32 %v1096_v27, %v977_v22  ;;  %v780_v29 = vpop.f32.mrb[11].mxu0 }
 0x339   : > { %1228 = vtanh.f32 %v778_v26  ;;  %v781_v30 = vadd.f32 %v977_v22, %v780_v29 }
 0x33a   : > { %1230 = vtanh.f32 %v789_v28 }
 0x33b   : > { %1232 = vtanh.f32 %v781_v30 }
 0x33d   : > { %v1099_v31 = vpop.f32.mrb[8].mxu1 }
 0x33e   : > { %v802_v32 = vadd.f32 %v1099_v31, %v977_v22  ;;  %v793_v33 = vpop.f32.mrb[9].mxu1 }
 0x33f   : > { %v794_v34 = vadd.f32 %v977_v22, %v793_v33  ;;  %v1100_v35 = vpop.f32.mrb[10].mxu1 }
 0x340   : > { %1234 = vtanh.f32 %v802_v32  ;;  %v805_v36 = vadd.f32 %v1100_v35, %v977_v22  ;;  %v796_v37 = vpop.f32.mrb[11].mxu1 }
 0x341   : > { %1236 = vtanh.f32 %v794_v34  ;;  %v797_v38 = vadd.f32 %v977_v22, %v796_v37 }
 0x342   : > { %v1227_v39 = vpop.eup %1226  ;;  %1238 = vtanh.f32 %v805_v36 }
 0x343   : > { %v1229_v40 = vpop.eup %1228  ;;  %818 = vst [vmem:[%s340_s12 + $0x10] sm:$0xff] %v1227_v39  ;;  %1240 = vtanh.f32 %v797_v38 }
 0x344   : > { %v1231_v41 = vpop.eup %1230  ;;  %816 = vst [vmem:[%s340_s12] sm:$0xff] %v1229_v40 }
 0x345   : > { %v1233_v42 = vpop.eup %1232  ;;  %819 = vst [vmem:[%s340_s12 + $0x18] sm:$0xff] %v1231_v41 }
 0x346   : > { %817 = vst [vmem:[%s340_s12 + $0x8] sm:$0xff] %v1233_v42 }
 0x34a   : > { %v1235_v43 = vpop.eup %1234 }
 0x34b   : > { %v1237_v44 = vpop.eup %1236  ;;  %822 = vst [vmem:[%s340_s12 + $0x30] sm:$0xff] %v1235_v43 }
 0x34c   : > { %v1239_v45 = vpop.eup %1238  ;;  %820 = vst [vmem:[%s340_s12 + $0x20] sm:$0xff] %v1237_v44 }
 0x34d   : > { %v1241_v46 = vpop.eup %1240  ;;  %823 = vst [vmem:[%s340_s12 + $0x38] sm:$0xff] %v1239_v45 }
 0x34e   : > { %821 = vst [vmem:[%s340_s12 + $0x28] sm:$0xff] %v1241_v46 }
 0x34f   : > { %1369 = shalt.err (!%p1366_p4)
}
 0x350   : > { %s1370_s15 = scalar_lea.hbm %s1721_s11, 1024  ;;  %s1374_s8 = scalar_lea.hbm %s1773_s7, 4096 }
 0x351   : > { %p1371_p9 = scmp.ne.s32.totalorder %s1721_s11, %s1370_s15  ;;  %p1375_p8 = scmp.lt.u32.totalorder %s1721_s11, %s1773_s7 }
 0x352   : > { %p1376_p12 = scmp.lt.u32.totalorder %s1374_s8, %s1370_s15  ;;  %p1378_p0 = scmp.lt.u32.totalorder %s1370_s15, %s1721_s11 }
 0x353   : > { %p1372_p13 = pnand %p1371_p9, %p1634_p5 }
 0x354   : > { %p1377_p6 = por %p1376_p12, %p1375_p8 }
 0x355   : > { %p1373_p10 = pneg %p1372_p13 }
 0x356   : > { %p1379_p3 = por %p1378_p0, %p1377_p6 }
 0x358   : > { %p1380_p7 = pnand %p1379_p3, %p1373_p10 }
 0x35a   : > { %1383 = shalt.err (!%p1380_p7)
}
 0x35b   : > { %s1439_s29 = smov 128   ;;  %s1440_s23 = smov 8  }
 0x35c   : > { %1131 = dma.vmem_to_hbm [thread:$0]  (%p1634_p5), %s1723_s16, 1024, %s1721_s11, %s825_s28, %s1439_s29, %s1439_s29, %s1440_s23  }
 0x35d PF: > { %s1793_s20 = sld [smem:[#allocation15_spill]]  ;;  %p1158_p11 = scmp.ge.s32.totalorder %s1430_s27, 2 }
 0x35e   : > { %s853_s30 = sand.u32 1, %s1418_s24  }
 0x35f   : > { %s854_s9 = scalar_lea.sflag [#allocation4], %s853_s30 }
 0x363   : > { %p1794_p1 = scmp.ne.s32.totalorder %s1793_s20, 0 }
 0x365   : > { %p1148_p2 = pnand %p1158_p11, %p1794_p1 }
 0x367   : > { %1413 = dma.done.wait (!%p1148_p2), %s854_s9, 1024  }
 0x368   : > { %1415 = vsyncadd (!%p1148_p2), %s854_s9, 4294966272  ;;  %p22_p4 = scmp.ge.s32.totalorder %s1620_s22, 6   ;;  %s1795_s24 = smov %s1422_s25 }
 0x369   : > { %s1796_s25 = smov %s1426_s26  ;;  %s1797_s26 = smov %s1630_s18 }
 0x36a   : > { %s1798_s27 = smov %s1620_s22  ;;  %24 = sbr.rel (!%p22_p4) target bundleno = 7 (0x7), region = 105 }
 0x371   :  { %859 = vsyncpa [#allocation3], 1 }
 0x372   :  { %861 = vsyncpa [#allocation3 + $0x1], 1 }
 0x373   :  { %862 = vsyncpa [#allocation6], 1 }
 0x374   :  { %863 = vsyncpa [#allocation9], 1 }
 0x375   :  { %864 = vsyncpa [#allocation4], 1 }
 0x376   :  { %866 = vsyncpa [#allocation4 + $0x1], 1 }

</bundles_post_ra>
